<compile_context>
chip_gen: v5e
topology: v5e:2x2
jax: 0.10.0
libtpu: 0.0.40
codegen_flags: <defaults>
</compile_context>

<pallas_src>
import functools

import jax
import jax.numpy as jnp
from jax import lax
from jax.experimental import pallas as pl
from jax.experimental.pallas import tpu as pltpu

_STATIC_UNROLL_MAX = 16  # fully unroll the chunk loop only when it is short


def _round_up(x, m):
    return (x + m - 1) // m * m


def _sublane_mult(dtype):
    """Minimum sublane multiple for a dtype's packed (sublane, 128) tiling."""
    itemsize = jnp.dtype(dtype).itemsize
    return 8 * max(1, 4 // max(itemsize, 1))  # f32->8, bf16->16, int8/bool->32


def _pow_term(x, p):
    """x**p using repeated VPU multiplies for integer p (no generic EUP pow)."""
    if p == 1:
        return x
    if p == 2:
        return x * x
    if isinstance(p, int) and p > 2:
        result = None
        base = x
        e = p
        while e:
            if e & 1:
                result = base if result is None else result * base
            e >>= 1
            if e:
                base = base * base
        return result
    # TODO(synk): fractional / non-positive p falls back to generic pow (EUP).
    return x ** p


def _hw_budgets():
    """(combined_input_tile_budget_bytes, vmem_limit_bytes, is_v7x)."""
    vmem_phys = 128 * 1024 * 1024
    try:
        vmem_phys = int(pltpu.get_tpu_info().vmem_capacity_bytes)
    except Exception:
        pass
    if vmem_phys <= 64 * 1024 * 1024:
        # v7x: 64 MiB physical VMEM per TC. 14 MiB combined inputs per step
        # -> ~28 MiB double-buffered + small outputs, capped at 44 MiB.
        return 14 * 1024 * 1024, 44 * 1024 * 1024, True
    # v5e / v6e: 128 MiB physical VMEM. 12 MiB combined inputs per step.
    return 12 * 1024 * 1024, 40 * 1024 * 1024, False


def _pick_tiles(nc, hw, probs_dtype, label_dtype):
    """VMEM-budgeted (row_blk, col_blk, vmem_limit) for a (nc, hw) reduction."""
    budget, vmem_limit, is_v7x = _hw_budgets()
    row_mult = max(_sublane_mult(probs_dtype), _sublane_mult(label_dtype))
    itemsize = jnp.dtype(probs_dtype).itemsize + jnp.dtype(label_dtype).itemsize

    hw_lanes = _round_up(hw, 128)
    nc_rows = _round_up(nc, row_mult)

    # Lane (last-dim) block: up to 8192 lanes normally; grow it when N*C is
    # small so the per-step DMA stays large.  Balanced blocks for awkward HW.
    max_col = 8192
    if nc_rows * max_col * itemsize < budget:
        max_col = max(max_col, (budget // (nc_rows * itemsize)) // 128 * 128)
    max_col = min(max_col, hw_lanes)
    n_col_blocks = max(1, pl.cdiv(hw, max_col))
    col_blk = min(hw_lanes, _round_up(pl.cdiv(hw, n_col_blocks), 128))

    # Sublane (row) block within the combined-input budget.
    row_blk = (budget // (col_blk * itemsize)) // row_mult * row_mult
    row_blk = max(row_mult, min(row_blk, 512, nc_rows))

    # v7x has 2 TensorCores: make sure the parallel row axis has >= 2 blocks
    # whenever the row count allows it.
    if is_v7x and pl.cdiv(nc, row_blk) < 2:
        half = _round_up(pl.cdiv(nc, 2), row_mult)
        if row_mult <= half < nc:
            row_blk = half

    return row_blk, col_blk, vmem_limit


def _dice_partial_kernel(probs_ref, label_ref, numer_ref, denom_ref, *,
                         p, hw, ragged):
    """Accumulate lane-folded partial sums for one (row_blk, col_blk) tile.

    probs_ref / label_ref : (row_blk, col_blk) VMEM tiles (native dtypes)
    numer_ref / denom_ref : (row_blk, 128) f32 outputs, resident across HW axis
    """
    j = pl.program_id(1)  # HW (reduction) axis, innermost

    @pl.when(j == 0)
    def _():
        numer_ref[...] = jnp.zeros_like(numer_ref)
        denom_ref[...] = jnp.zeros_like(denom_ref)

    row_blk, col_blk = probs_ref.shape
    nchunks = col_blk // 128

    if ragged:
        # Hoisted loop invariants for the ragged-lane mask.
        lane_idx = lax.broadcasted_iota(jnp.int32, (row_blk, 128), 1)
        col_base = j * col_blk

    def _accum(off):
        pr = probs_ref[:, pl.ds(off, 128)].astype(jnp.float32)
        lb = label_ref[:, pl.ds(off, 128)].astype(jnp.float32)
        num_t = pr * lb
        den_t = _pow_term(pr, p) + _pow_term(lb, p)
        if ragged:
            # Mask the *terms* (not the inputs): exact for any p, and kills
            # any garbage (NaN/Inf) from out-of-bounds lanes of edge blocks.
            valid = lane_idx < (hw - col_base - off)
            num_t = jnp.where(valid, num_t, 0.0)
            den_t = jnp.where(valid, den_t, 0.0)
        # Per-chunk accumulation directly into the resident output blocks:
        # bounded vreg live ranges, hidden under the tile DMA.
        numer_ref[...] += num_t
        denom_ref[...] += den_t

    if nchunks <= _STATIC_UNROLL_MAX:
        for c in range(nchunks):
            _accum(c * 128)
    else:
        @pl.loop(0, nchunks)
        def _(c):
            _accum(pl.multiple_of(c * 128, 128))


def dice_loss(probs, label, *, p=1, smooth=1.0, reduction="mean", weight=None):
    assert probs.shape == label.shape, (probs.shape, label.shape)
    N, C, H, W = probs.shape
    NC, HW = N * C, H * W

    # Keep labels in their native (narrow) dtype; only bools get widened to
    # int8 so the DMA/layout is well defined.  The kernel upcasts per chunk.
    if label.dtype == jnp.bool_:
        label = label.astype(jnp.int8)

    probs2 = probs.reshape(NC, HW)
    label2 = label.reshape(NC, HW)

    row_blk, col_blk, vmem_limit = _pick_tiles(NC, HW, probs2.dtype,
                                               label2.dtype)
    grid = (pl.cdiv(NC, row_blk), pl.cdiv(HW, col_blk))
    ragged = (HW % col_blk) != 0

    kernel = functools.partial(_dice_partial_kernel, p=p, hw=HW, ragged=ragged)
    numer_p, denom_p = pl.pallas_call(
        kernel,
        out_shape=(
            jax.ShapeDtypeStruct((NC, 128), jnp.float32),
            jax.ShapeDtypeStruct((NC, 128), jnp.float32),
        ),
        grid_spec=pltpu.PrefetchScalarGridSpec(
            num_scalar_prefetch=0,
            grid=grid,
            in_specs=[
                pl.BlockSpec((row_blk, col_blk), lambda i, j: (i, j)),
                pl.BlockSpec((row_blk, col_blk), lambda i, j: (i, j)),
            ],
            out_specs=[
                pl.BlockSpec((row_blk, 128), lambda i, j: (i, 0)),
                pl.BlockSpec((row_blk, 128), lambda i, j: (i, 0)),
            ],
        ),
        compiler_params=pltpu.CompilerParams(
            # Rows are independent -> shard across TensorCores (v7x megacore);
            # HW is the reduction axis -> must stay 'arbitrary' (innermost).
            dimension_semantics=("parallel", "arbitrary"),
            vmem_limit_bytes=vmem_limit,
        ),
    )(probs2, label2)

    # Cheap epilogue in the wrapper: cross-lane reduce, optional class weight
    # (matches the PyTorch module: weight scales numer and denom), divide, mean.
    numer = jnp.sum(numer_p, axis=1).reshape(N, C)
    denom = jnp.sum(denom_p, axis=1).reshape(N, C)
    if weight is not None:
        w = jnp.asarray(weight, jnp.float32).reshape(1, -1)
        numer = numer * w
        denom = denom * w
    loss = 1.0 - (2.0 * numer + smooth) / (denom + smooth)
    if reduction == "mean":
        loss = jnp.mean(loss)
    return loss


def dice_loss_ref(probs, label, *, p=1, smooth=1.0, weight=None):
    probs = probs.astype(jnp.float32)
    label = label.astype(jnp.float32)
    numer = jnp.sum(probs * label, axis=(2, 3))
    denom = jnp.sum(probs ** p + label ** p, axis=(2, 3))
    if weight is not None:
        w = jnp.asarray(weight, jnp.float32).reshape(1, -1)
        numer = numer * w
        denom = denom * w
    loss = 1.0 - (2.0 * numer + smooth) / (denom + smooth)
    return jnp.mean(loss)


if __name__ == "__main__":
    key = jax.random.PRNGKey(0)
    k1, k2, k3, k4 = jax.random.split(key, 4)

    # Check 1: lane-aligned HW, default p=1.
    N, C, H, W = 2, 4, 16, 16
    probs = jax.nn.sigmoid(jax.random.normal(k1, (N, C, H, W), dtype=jnp.float32))
    label = (jax.random.uniform(k2, (N, C, H, W)) > 0.5).astype(jnp.float32)

    out = dice_loss(probs, label, p=1, smooth=1.0, reduction="mean")
    out = jax.block_until_ready(out)
    ref = dice_loss_ref(probs, label, p=1, smooth=1.0)
    assert jnp.allclose(out, ref, rtol=1e-5, atol=1e-5), (out, ref)

    # Check 2: ragged HW (exercises the in-kernel lane mask), p=2 + class weight.
    N2, C2, H2, W2 = 2, 3, 9, 14
    probs2 = jax.nn.sigmoid(jax.random.normal(k3, (N2, C2, H2, W2), dtype=jnp.float32))
    label2 = (jax.random.uniform(k4, (N2, C2, H2, W2)) > 0.5).astype(jnp.float32)
    wgt = [0.2, 0.3, 0.5]

    out2 = dice_loss(probs2, label2, p=2, smooth=1.0, reduction="mean", weight=wgt)
    out2 = jax.block_until_ready(out2)
    ref2 = dice_loss_ref(probs2, label2, p=2, smooth=1.0, weight=wgt)
    assert jnp.allclose(out2, ref2, rtol=1e-5, atol=1e-5), (out2, ref2)

    print("KERNEL_OK")
</pallas_src>

<mosaic_0001>
module attributes {stable_mosaic.version = 11 : i64} {
  func.func @_dice_partial_kernel(%arg0: i32, %arg1: i32, %arg2: memref<8x256xf32, #tpu.memory_space<vmem>>, %arg3: memref<8x256xf32, #tpu.memory_space<vmem>>, %arg4: memref<8x128xf32, #tpu.memory_space<vmem>>, %arg5: memref<8x128xf32, #tpu.memory_space<vmem>>) attributes {dimension_semantics = [#tpu.dimension_semantics<parallel>, #tpu.dimension_semantics<arbitrary>], iteration_bounds = array<i64: 1, 1>, scalar_prefetch = 0 : i64, scratch_operands = 0 : i64, tpu.core_type = #tpu.core_type<tc>, window_params = [{transform_indices = @transform_0, window_bounds = array<i64: 8, 256>}, {transform_indices = @transform_1, window_bounds = array<i64: 8, 256>}, {transform_indices = @transform_2, window_bounds = array<i64: 8, 128>}, {transform_indices = @transform_3, window_bounds = array<i64: 8, 128>}]} {
    %c0_i32 = arith.constant 0 : i32
    %0 = arith.cmpi eq, %arg1, %c0_i32 : i32
    %1 = arith.extui %0 : i1 to i32
    %c0_i32_0 = arith.constant 0 : i32
    %2 = arith.cmpi ne, %1, %c0_i32_0 : i32
    scf.if %2 {
      %cst = arith.constant 0.000000e+00 : f32
      %23 = vector.broadcast %cst : f32 to vector<8x128xf32>
      %c0_23 = arith.constant 0 : index
      %c0_24 = arith.constant 0 : index
      %24 = vector.load %arg4[%c0_23, %c0_24] : memref<8x128xf32, #tpu.memory_space<vmem>>, vector<8x128xf32>
      tpu.vector_store %arg4[%c0_23, %c0_24], %23 {strides = array<i32>} : memref<8x128xf32, #tpu.memory_space<vmem>>, vector<8x128xf32>,
      %cst_25 = arith.constant 0.000000e+00 : f32
      %25 = vector.broadcast %cst_25 : f32 to vector<8x128xf32>
      %c0_26 = arith.constant 0 : index
      %c0_27 = arith.constant 0 : index
      %26 = vector.load %arg5[%c0_26, %c0_27] : memref<8x128xf32, #tpu.memory_space<vmem>>, vector<8x128xf32>
      tpu.vector_store %arg5[%c0_26, %c0_27], %25 {strides = array<i32>} : memref<8x128xf32, #tpu.memory_space<vmem>>, vector<8x128xf32>,
    } else {
    }
    %c0 = arith.constant 0 : index
    %c0_1 = arith.constant 0 : index
    %3 = vector.load %arg2[%c0, %c0_1] : memref<8x256xf32, #tpu.memory_space<vmem>>, vector<8x128xf32>
    %c0_2 = arith.constant 0 : index
    %c0_3 = arith.constant 0 : index
    %4 = vector.load %arg3[%c0_2, %c0_3] : memref<8x256xf32, #tpu.memory_space<vmem>>, vector<8x128xf32>
    %5 = arith.mulf %3, %4 : vector<8x128xf32>
    %6 = arith.addf %3, %4 : vector<8x128xf32>
    %c0_4 = arith.constant 0 : index
    %c0_5 = arith.constant 0 : index
    %7 = vector.load %arg4[%c0_4, %c0_5] : memref<8x128xf32, #tpu.memory_space<vmem>>, vector<8x128xf32>
    %8 = arith.addf %7, %5 : vector<8x128xf32>
    %c0_6 = arith.constant 0 : index
    %c0_7 = arith.constant 0 : index
    %9 = vector.load %arg4[%c0_6, %c0_7] : memref<8x128xf32, #tpu.memory_space<vmem>>, vector<8x128xf32>
    tpu.vector_store %arg4[%c0_6, %c0_7], %8 {strides = array<i32>} : memref<8x128xf32, #tpu.memory_space<vmem>>, vector<8x128xf32>,
    %c0_8 = arith.constant 0 : index
    %c0_9 = arith.constant 0 : index
    %10 = vector.load %arg5[%c0_8, %c0_9] : memref<8x128xf32, #tpu.memory_space<vmem>>, vector<8x128xf32>
    %11 = arith.addf %10, %6 : vector<8x128xf32>
    %c0_10 = arith.constant 0 : index
    %c0_11 = arith.constant 0 : index
    %12 = vector.load %arg5[%c0_10, %c0_11] : memref<8x128xf32, #tpu.memory_space<vmem>>, vector<8x128xf32>
    tpu.vector_store %arg5[%c0_10, %c0_11], %11 {strides = array<i32>} : memref<8x128xf32, #tpu.memory_space<vmem>>, vector<8x128xf32>,
    %c0_12 = arith.constant 0 : index
    %c128 = arith.constant 128 : index
    %13 = vector.load %arg2[%c0_12, %c128] : memref<8x256xf32, #tpu.memory_space<vmem>>, vector<8x128xf32>
    %c0_13 = arith.constant 0 : index
    %c128_14 = arith.constant 128 : index
    %14 = vector.load %arg3[%c0_13, %c128_14] : memref<8x256xf32, #tpu.memory_space<vmem>>, vector<8x128xf32>
    %15 = arith.mulf %13, %14 : vector<8x128xf32>
    %16 = arith.addf %13, %14 : vector<8x128xf32>
    %c0_15 = arith.constant 0 : index
    %c0_16 = arith.constant 0 : index
    %17 = vector.load %arg4[%c0_15, %c0_16] : memref<8x128xf32, #tpu.memory_space<vmem>>, vector<8x128xf32>
    %18 = arith.addf %17, %15 : vector<8x128xf32>
    %c0_17 = arith.constant 0 : index
    %c0_18 = arith.constant 0 : index
    %19 = vector.load %arg4[%c0_17, %c0_18] : memref<8x128xf32, #tpu.memory_space<vmem>>, vector<8x128xf32>
    tpu.vector_store %arg4[%c0_17, %c0_18], %18 {strides = array<i32>} : memref<8x128xf32, #tpu.memory_space<vmem>>, vector<8x128xf32>,
    %c0_19 = arith.constant 0 : index
    %c0_20 = arith.constant 0 : index
    %20 = vector.load %arg5[%c0_19, %c0_20] : memref<8x128xf32, #tpu.memory_space<vmem>>, vector<8x128xf32>
    %21 = arith.addf %20, %16 : vector<8x128xf32>
    %c0_21 = arith.constant 0 : index
    %c0_22 = arith.constant 0 : index
    %22 = vector.load %arg5[%c0_21, %c0_22] : memref<8x128xf32, #tpu.memory_space<vmem>>, vector<8x128xf32>
    tpu.vector_store %arg5[%c0_21, %c0_22], %21 {strides = array<i32>} : memref<8x128xf32, #tpu.memory_space<vmem>>, vector<8x128xf32>,
    return
  }
  func.func @transform_0(%arg0: i32, %arg1: i32) -> (i32, i32) {
    %c0_i32 = arith.constant 0 : i32
    return %arg0, %arg1 : i32, i32
  }
  func.func @transform_1(%arg0: i32, %arg1: i32) -> (i32, i32) {
    %c0_i32 = arith.constant 0 : i32
    return %arg0, %arg1 : i32, i32
  }
  func.func @transform_2(%arg0: i32, %arg1: i32) -> (i32, i32) {
    %c0_i32 = arith.constant 0 : i32
    %c0_i32_0 = arith.constant 0 : i32
    return %arg0, %c0_i32 : i32, i32
  }
  func.func @transform_3(%arg0: i32, %arg1: i32) -> (i32, i32) {
    %c0_i32 = arith.constant 0 : i32
    %c0_i32_0 = arith.constant 0 : i32
    return %arg0, %c0_i32 : i32, i32
  }
}

</mosaic_0001>

<bundles_post_ra>
// kernel: tpu_custom_call.1
= control target key start
LH: loop header
LB: loop body
LE: loop exit
PB: predicated region body
PF: predicated region fallthrough
CT: control target
= control target key end

     0   :  { %9 = vsyncpa [#allocation3], 0  ;;  %s248_s0 = inlined_call_operand.hbm [shape: f32[8,256], index: 0, kind: input, shape index: {}]   ;;  %s249_s1 = inlined_call_operand.hbm [shape: f32[8,256], index: 1, kind: input, shape index: {}]   ;;  %s250_s2 = inlined_call_operand.hbm [shape: f32[8,128], index: 2, kind: output, shape index: {0}]   ;;  %s251_s3 = inlined_call_operand.hbm [shape: f32[8,128], index: 3, kind: output, shape index: {1}]  }
   0x1   :  { %10 = vsyncpa [#allocation6], 0 }
   0x2   :  { %11 = vsyncpa [#allocation4], 0 }
   0x3   :  { %12 = vsyncpa [#allocation9], 0  ;;  %s18_s14 = sshll.u32 %s248_s0, 4  ;;  %s212_s15 = smov [#allocation2]   ;;  %s19_s14 = int_to_ptr.hbm [resolvable:$true] %s18_s14 }
   0x4   :  { %s20_s16 = sshll.u32 %s212_s15, 4  ;;  %s29_s19 = sshll.u32 %s249_s1, 4  ;;  %s21_s16 = int_to_ptr.vmem [resolvable:$true] %s20_s16  ;;  %s30_s19 = int_to_ptr.hbm [resolvable:$true] %s29_s19 }
   0x5   :  { %23 = dma.hbm_to_vmem [thread:$0]  %s19_s14, 256, %s21_s16, [#allocation3]  }
   0x6   :  { %s213_s20 = smov [#allocation5]  }
   0x7   :  { %s31_s21 = sshll.u32 %s213_s20, 4  ;;  %s32_s21 = int_to_ptr.vmem [resolvable:$true] %s31_s21 }
   0x8   :  { %34 = dma.hbm_to_vmem [thread:$0]  %s30_s19, 256, %s32_s21, [#allocation6]  }
   0x9   :  { %204 = dma.done.wait [#allocation3], 256  }
   0xa   :  { %205 = vsyncadd [#allocation3], 4294967040 }
   0xb   :  { %206 = dma.done.wait [#allocation6], 256  }
   0xc   :  { %207 = vsyncadd [#allocation6], 4294967040  ;;  %v49_v0 = vld [vmem:[#allocation2] sm:$0xff]  ;;  %v50_v1 = vld [vmem:[#allocation5] sm:$0xff]  ;;  %s214_s0 = smov [#allocation7]   ;;  %s76_s24 = sshll.u32 %s250_s2, 4  ;;  %s77_s24 = int_to_ptr.hbm [resolvable:$true] %s76_s24 }
   0xd   :  { %v59_v2 = vld [vmem:[#allocation2 + $0x8] sm:$0xff]  ;;  %v51_v3 = vmul.f32 %v50_v1, %v49_v0  ;;  %v52_v4 = vadd.f32 %v50_v1, %v49_v0  ;;  %v60_v5 = vld [vmem:[#allocation5 + $0x8] sm:$0xff]  ;;  %s74_s1 = sshll.u32 %s214_s0, 4  ;;  %s215_s25 = smov [#allocation8]   ;;  %s75_s1 = int_to_ptr.vmem [resolvable:$true] %s74_s1 }
   0xe   :  { %v61_v6 = vmul.f32 %v60_v5, %v59_v2  ;;  %v62_v7 = vadd.f32 %v60_v5, %v59_v2  ;;  %s85_s26 = sshll.u32 %s215_s25, 4  ;;  %s87_s29 = sshll.u32 %s251_s3, 4  ;;  %s86_s26 = int_to_ptr.vmem [resolvable:$true] %s85_s26  ;;  %s88_s29 = int_to_ptr.hbm [resolvable:$true] %s87_s29 }
  0x10   :  { %v64_v8 = vadd.f32 %v61_v6, %v51_v3  ;;  %v67_v9 = vadd.f32 %v62_v7, %v52_v4 }
  0x12   :  { %65 = vst [vmem:[#allocation7] sm:$0xff] %v64_v8 }
  0x13   :  { %68 = vst [vmem:[#allocation8] sm:$0xff] %v67_v9  ;;  %79 = dma.vmem_to_hbm [thread:$0]  %s75_s1, 128, %s77_s24, [#allocation4]  }
  0x14   :  { %90 = dma.vmem_to_hbm [thread:$0]  %s86_s26, 128, %s88_s29, [#allocation9]  }
  0x15   :  { %208 = dma.done.wait [#allocation4], 128  }
  0x16   :  { %209 = vsyncadd [#allocation4], 4294967168 }
  0x17   :  { %210 = dma.done.wait [#allocation9], 128  }
  0x18   :  { %211 = vsyncadd [#allocation9], 4294967168 }
  0x19   :  { %99 = vsyncpa [#allocation3], 1 }
  0x1a   :  { %100 = vsyncpa [#allocation6], 1 }
  0x1b   :  { %101 = vsyncpa [#allocation4], 1 }
  0x1c   :  { %102 = vsyncpa [#allocation9], 1 }

</bundles_post_ra>
